<compile_context>
chip_gen: v5e
topology: v5e:2x2
jax: 0.10.0
libtpu: 0.0.40
codegen_flags: <defaults>
</compile_context>

<pallas_src>
import functools

import jax
import jax.numpy as jnp
from jax import lax
from jax.experimental import pallas as pl
from jax.experimental.pallas import tpu as pltpu

_EPS = 1e-12        # F.normalize eps: 1/max(||x||,eps) == rsqrt(max(sumsq, eps^2))
_NEG_BIG = -1e30    # finite "-inf" for masking padded key columns
_VMEM_LIMIT = 48 * 1024 * 1024   # safe on v5e (128 MiB), v6e (128 MiB), v7x (64 MiB)


def _round_up(x, m):
    return ((x + m - 1) // m) * m


def _pick_query_tile(n):
    """Device-independent default query tile (multiple of 16).

    >= 2 query tiles whenever n allows it (so both v7x TensorCores get work),
    capped at 512 rows (key-stream arithmetic intensity = tq flop/byte in bf16).
    """
    n16 = _round_up(max(n, 1), 16)
    if n16 >= 1024:
        return 512
    if n16 >= 32:
        return _round_up(n16 // 2, 16)      # split into (at least) two tiles
    return n16


def _pad2(x, rows, cols):
    r, c = x.shape
    if r == rows and c == cols:
        return x
    return jnp.pad(x, ((0, rows - r), (0, cols - c)))


# ----------------------------------------------------------------------------
# Pass 1a: fused q/p normalization + f32 positive logit  (one pallas_call).
# ----------------------------------------------------------------------------
def _normalize_qp_kernel(q_ref, p_ref, qn_ref, pn_ref, pos_ref, *, inv_temp):
    q = q_ref[...].astype(jnp.float32)
    p = p_ref[...].astype(jnp.float32)
    q_inv = lax.rsqrt(jnp.maximum(jnp.sum(q * q, axis=-1, keepdims=True),
                                  _EPS * _EPS))          # EUP rsqrt, no divide
    p_inv = lax.rsqrt(jnp.maximum(jnp.sum(p * p, axis=-1, keepdims=True),
                                  _EPS * _EPS))
    qn = q * q_inv
    pn = p * p_inv
    qn_ref[...] = qn.astype(qn_ref.dtype)
    pn_ref[...] = pn.astype(pn_ref.dtype)
    # f32 positive logit, already scaled by 1/temperature.
    pos_ref[...] = jnp.sum(qn * pn, axis=-1, keepdims=True) * inv_temp


def _normalize_qp(q_pad, p_pad, *, tile, out_dtype, inv_temp):
    rows, dp = q_pad.shape
    return pl.pallas_call(
        functools.partial(_normalize_qp_kernel, inv_temp=inv_temp),
        out_shape=(jax.ShapeDtypeStruct((rows, dp), out_dtype),
                   jax.ShapeDtypeStruct((rows, dp), out_dtype),
                   jax.ShapeDtypeStruct((rows, 1), jnp.float32)),
        grid_spec=pltpu.PrefetchScalarGridSpec(
            num_scalar_prefetch=0,
            grid=(rows // tile,),
            in_specs=[pl.BlockSpec((tile, dp), lambda i: (i, 0)),
                      pl.BlockSpec((tile, dp), lambda i: (i, 0))],
            out_specs=[pl.BlockSpec((tile, dp), lambda i: (i, 0)),
                       pl.BlockSpec((tile, dp), lambda i: (i, 0)),
                       pl.BlockSpec((tile, 1), lambda i: (i, 0))],
        ),
        compiler_params=pltpu.CompilerParams(
            dimension_semantics=("parallel",),
            vmem_limit_bytes=_VMEM_LIMIT),
    )(q_pad, p_pad)


# ----------------------------------------------------------------------------
# Pass 1b: row-tiled L2 normalization of the negative keys (unpaired mode).
# ----------------------------------------------------------------------------
def _normalize_kernel(x_ref, o_ref):
    x = x_ref[...].astype(jnp.float32)
    inv = lax.rsqrt(jnp.maximum(jnp.sum(x * x, axis=-1, keepdims=True),
                                _EPS * _EPS))
    o_ref[...] = (x * inv).astype(o_ref.dtype)


def _normalize_rows(x_pad, *, tile, out_dtype):
    rows, dp = x_pad.shape
    return pl.pallas_call(
        _normalize_kernel,
        out_shape=jax.ShapeDtypeStruct((rows, dp), out_dtype),
        grid_spec=pltpu.PrefetchScalarGridSpec(
            num_scalar_prefetch=0,
            grid=(rows // tile,),
            in_specs=[pl.BlockSpec((tile, dp), lambda i: (i, 0))],
            out_specs=pl.BlockSpec((tile, dp), lambda i: (i, 0)),
        ),
        compiler_params=pltpu.CompilerParams(
            dimension_semantics=("parallel",),
            vmem_limit_bytes=_VMEM_LIMIT),
    )(x_pad)


# ----------------------------------------------------------------------------
# Pass 2: flash-style online-logsumexp loss kernel (shared by both modes).
#   pos_in_keys=True  : negative_keys=None path, labels = arange(N)
#   pos_in_keys=False : 'unpaired' path, labels = 0 (logaddexp with the pos).
# ----------------------------------------------------------------------------
def _ntxent_lse_kernel(q_ref, k_ref, pos_ref, o_ref, m_sc, l_sc, *,
                       n_rows, n_keys, tq, tk, nkt, pos_in_keys,
                       keys_resident, inv_temp):
    qi = pl.program_id(0)
    ki = pl.program_id(1)

    @pl.when(ki == 0)
    def _init():
        m_sc[...] = jnp.full(m_sc.shape, _NEG_BIG, jnp.float32)
        l_sc[...] = jnp.zeros(l_sc.shape, jnp.float32)

    q = q_ref[...]                                       # (tq, dp)
    if keys_resident:
        # Full key matrix is VMEM-resident (fetched from HBM once);
        # slice the current key tile out of it.
        start = pl.multiple_of(ki * tk, 16)
        k = k_ref[pl.ds(start, tk), :]                   # (tk, dp)
    else:
        k = k_ref[...]                                   # (tk, dp) streamed tile

    # MXU: contract the lane dim of both operands directly (no transpose),
    # f32 accumulation; apply 1/temperature to the f32 scores (keeps bf16
    # operand precision independent of the temperature).
    s = lax.dot_general(q, k, (((1,), (1,)), ((), ())),
                        preferred_element_type=jnp.float32) * inv_temp

    def _update(sv):
        m_prev = m_sc[...]
        l_prev = l_sc[...]
        m_new = jnp.maximum(m_prev, jnp.max(sv, axis=-1, keepdims=True))
        l_sc[...] = (jnp.exp(m_prev - m_new) * l_prev
                     + jnp.sum(jnp.exp(sv - m_new), axis=-1, keepdims=True))
        m_sc[...] = m_new

    first_masked = n_keys // tk          # first key tile containing padded cols
    if n_keys < nkt * tk:                # static: some key columns are padding
        @pl.when(ki >= first_masked)     # mask only on the tiles that need it
        def _masked():
            col = lax.broadcasted_iota(jnp.int32, (tq, tk), 1)
            _update(jnp.where(col < (n_keys - ki * tk), s, _NEG_BIG))

        @pl.when(ki < first_masked)
        def _unmasked():
            _update(s)
    else:
        _update(s)

    @pl.when(ki == nkt - 1)
    def _finalize():
        lse = m_sc[...] + jnp.log(l_sc[...])             # (tq, 1)
        pos = pos_ref[...]                               # (tq, 1) f32, already / T
        if pos_in_keys:
            per = lse - pos                              # CE with labels = arange(N)
        else:
            mx = jnp.maximum(lse, pos)                   # CE with labels = 0
            per = mx + jnp.log(jnp.exp(lse - mx) + jnp.exp(pos - mx)) - pos
        if n_rows % tq != 0:   # static: zero the padded query rows
            row = qi * tq + lax.broadcasted_iota(jnp.int32, (tq, 1), 0)
            per = jnp.where(row < n_rows, per, 0.0)
        o_ref[...] = per


def _tiled_lse_loss(qn, keys, pos, *, n_rows, n_keys, tq, tk, pos_in_keys,
                    keys_resident, inv_temp):
    npad, dp = qn.shape
    kpad = keys.shape[0]
    nqt = npad // tq
    nkt = kpad // tk
    k_esize = keys.dtype.itemsize
    q_esize = qn.dtype.itemsize

    if keys_resident:
        key_spec = pl.BlockSpec((kpad, dp), lambda i, j: (0, 0))   # fetched once
        key_bytes = kpad * dp * k_esize
    else:
        key_spec = pl.BlockSpec((tk, dp), lambda i, j: (j, 0))     # streamed per q-tile
        key_bytes = kpad * dp * k_esize * nqt

    cost = pl.CostEstimate(
        flops=2 * npad * kpad * dp,
        transcendentals=npad * kpad,
        bytes_accessed=int(npad * dp * q_esize + key_bytes + npad * 4 * 2))

    kernel = functools.partial(
        _ntxent_lse_kernel, n_rows=n_rows, n_keys=n_keys, tq=tq, tk=tk, nkt=nkt,
        pos_in_keys=pos_in_keys, keys_resident=keys_resident, inv_temp=inv_temp)

    return pl.pallas_call(
        kernel,
        out_shape=jax.ShapeDtypeStruct((npad, 1), jnp.float32),
        grid_spec=pltpu.PrefetchScalarGridSpec(
            num_scalar_prefetch=0,
            grid=(nqt, nkt),
            in_specs=[
                pl.BlockSpec((tq, dp), lambda i, j: (i, 0)),   # queries (resident over key axis)
                key_spec,                                      # keys / negatives
                pl.BlockSpec((tq, 1), lambda i, j: (i, 0)),    # precomputed f32 positive logit
            ],
            out_specs=pl.BlockSpec((tq, 1), lambda i, j: (i, 0)),
            scratch_shapes=[pltpu.VMEM((tq, 1), jnp.float32),  # running max m
                            pltpu.VMEM((tq, 1), jnp.float32)], # running sum l
        ),
        compiler_params=pltpu.CompilerParams(
            dimension_semantics=("parallel", "arbitrary"),
            vmem_limit_bytes=_VMEM_LIMIT),
        cost_estimate=cost,
    )(qn, keys, pos)


# ----------------------------------------------------------------------------
# Wrapper mirroring NTXent.forward
# ----------------------------------------------------------------------------
def ntxent_loss(query, positive_key, negative_keys=None, *,
                temperature=0.1, alpha=0.3, reduction="mean",
                negative_mode="unpaired", use_bf16_matmul=True,
                block_q=None, block_k=None, keys_resident=None):
    # NOTE: `alpha` only affects negative_mode='paired' in the reference module
    # (unimplemented below), so it is accepted for API parity but unused here.
    if query.ndim != 2 or positive_key.ndim != 2:
        raise ValueError("<query>/<positive_key> must have 2 dimensions.")
    if query.shape[0] != positive_key.shape[0]:
        raise ValueError("<query> and <positive_key> must have the same number of samples.")
    if query.shape[-1] != positive_key.shape[-1]:
        raise ValueError("<query> and <positive_key> feature dims must match.")
    if reduction not in ("mean", "sum", "none"):
        raise ValueError("reduction must be 'mean', 'sum' or 'none'")

    n, d = query.shape
    dp = _round_up(d, 128)                  # lane-align features (zero pad is exact)
    inv_t = 1.0 / float(temperature)
    op_dtype = jnp.bfloat16 if use_bf16_matmul else jnp.float32
    esize = 2 if use_bf16_matmul else 4

    if block_q is not None:
        tq = min(_round_up(block_q, 16), _round_up(n, 16))   # bf16 sublane pack = 16
    else:
        tq = _pick_query_tile(n)
        if not use_bf16_matmul:
            tq = min(tq, 256)               # keep f32 tiles inside the VMEM budget
    rpad = _round_up(n, tq)

    # Pass 1a: fused normalize(q), normalize(p) and f32 positive logit / T.
    # (pass-1 row tile need not match tq; keep it modest so pass 1 fits VMEM.)
    t1 = tq if (tq <= 256 or tq % 256 != 0) else 256
    q_pad = _pad2(query.astype(jnp.float32), rpad, dp)
    p_pad = _pad2(positive_key.astype(jnp.float32), rpad, dp)
    qn, pn, pos = _normalize_qp(q_pad, p_pad, tile=t1, out_dtype=op_dtype,
                                inv_temp=inv_t)

    if negative_keys is None:
        # Keys are the normalized positives; the positive logit is on the diagonal.
        tk = 256 if tq % 256 == 0 else tq   # tk always divides rpad
        keys = pn
        n_keys = n
        pos_in_keys = True
    elif negative_mode == "unpaired":
        if negative_keys.ndim != 2:
            raise ValueError("<negative_keys> must have 2 dims if negative_mode == 'unpaired'.")
        if negative_keys.shape[-1] != d:
            raise ValueError("<query> and <negative_keys> feature dims must match.")
        m = negative_keys.shape[0]
        if block_k is not None:
            tk = min(_round_up(block_k, 16), _round_up(m, 16))
        else:
            tk = min(256, _round_up(m, 16))
        kpad = _round_up(m, tk)
        nk_pad = _pad2(negative_keys.astype(jnp.float32), kpad, dp)
        keys = _normalize_rows(nk_pad, tile=tk, out_dtype=op_dtype)
        n_keys = m
        pos_in_keys = False
    else:
        # TODO(synk): negative_mode='paired' (off-diagonal boolean-mask gather of
        # q @ q.T scaled by alpha, concatenated with per-sample paired negatives)
        # is not implemented as a Pallas kernel.
        raise NotImplementedError("negative_mode='paired' not implemented")

    kpad = keys.shape[0]
    if keys_resident is None:
        # Keep the whole normalized key matrix VMEM-resident when it is small
        # enough (conservative: assume double-buffered allocation).
        keys_resident = (2 * kpad * dp * esize) <= (16 * 1024 * 1024)

    per = _tiled_lse_loss(qn, keys, pos, n_rows=n, n_keys=n_keys, tq=tq, tk=tk,
                          pos_in_keys=pos_in_keys, keys_resident=keys_resident,
                          inv_temp=inv_t)

    if reduction == "mean":
        return jnp.sum(per) / n
    if reduction == "sum":
        return jnp.sum(per)
    return per[:n, 0]          # 'none'


# ----------------------------------------------------------------------------
# Pure-JAX reference (mirrors the PyTorch code) for sanity checks.
# ----------------------------------------------------------------------------
def _ref_loss(query, positive_key, negative_keys=None, temperature=0.1, reduction="mean"):
    def norm(x):
        nrm = jnp.linalg.norm(x, axis=-1, keepdims=True)
        return x / jnp.maximum(nrm, _EPS)
    qn = norm(query.astype(jnp.float32))
    pn = norm(positive_key.astype(jnp.float32))
    if negative_keys is None:
        logits = qn @ pn.T
        labels = jnp.arange(qn.shape[0])
    else:
        nkn = norm(negative_keys.astype(jnp.float32))
        pos = jnp.sum(qn * pn, axis=1, keepdims=True)
        neg = qn @ nkn.T
        logits = jnp.concatenate([pos, neg], axis=1)
        labels = jnp.zeros((qn.shape[0],), jnp.int32)
    logp = jax.nn.log_softmax(logits / temperature, axis=-1)
    per = -jnp.take_along_axis(logp, labels[:, None], axis=1)[:, 0]
    if reduction == "mean":
        return jnp.mean(per)
    if reduction == "sum":
        return jnp.sum(per)
    return per


if __name__ == "__main__":
    key = jax.random.PRNGKey(0)
    k1, k2, k3, k4, k5, k6 = jax.random.split(key, 6)

    # Small demo shapes.
    N, D, M = 8, 32, 16
    query = jax.random.normal(k1, (N, D), dtype=jnp.float32)
    positive_key = jax.random.normal(k2, (N, D), dtype=jnp.float32)
    negative_keys = jax.random.normal(k3, (M, D), dtype=jnp.float32)

    ref_self = _ref_loss(query, positive_key, temperature=0.1)
    ref_unp = _ref_loss(query, positive_key, negative_keys, temperature=0.1)

    # f32-operand path: tight check against the reference.
    l_self_f32 = ntxent_loss(query, positive_key, temperature=0.1,
                             use_bf16_matmul=False)
    l_unp_f32 = ntxent_loss(query, positive_key, negative_keys, temperature=0.1,
                            use_bf16_matmul=False)
    jax.block_until_ready(l_self_f32)
    jax.block_until_ready(l_unp_f32)
    assert jnp.allclose(l_self_f32, ref_self, rtol=1e-5, atol=1e-5), (l_self_f32, ref_self)
    assert jnp.allclose(l_unp_f32, ref_unp, rtol=1e-5, atol=1e-5), (l_unp_f32, ref_unp)

    # Default path: bf16 MXU operands, f32 accumulation + f32 positive logit.
    l_self = ntxent_loss(query, positive_key, temperature=0.1)
    l_unp = ntxent_loss(query, positive_key, negative_keys, temperature=0.1)
    jax.block_until_ready(l_self)
    jax.block_until_ready(l_unp)
    assert jnp.allclose(l_self, ref_self, rtol=1e-1, atol=1e-1), (l_self, ref_self)
    assert jnp.allclose(l_unp, ref_unp, rtol=1e-1, atol=1e-1), (l_unp, ref_unp)

    # reduction='none' path.
    l_none = ntxent_loss(query, positive_key, negative_keys, reduction="none",
                         use_bf16_matmul=False)
    ref_none = _ref_loss(query, positive_key, negative_keys, reduction="none")
    jax.block_until_ready(l_none)
    assert l_none.shape == (N,)
    assert jnp.allclose(l_none, ref_none, rtol=1e-5, atol=1e-5)

    # Multi-tile grids with row/column masking (N, M not multiples of the tiles),
    # exercising both the VMEM-resident-keys and the key-streaming paths.
    N2, D2, M2 = 200, 40, 300
    q2 = jax.random.normal(k4, (N2, D2), dtype=jnp.float32)
    p2 = jax.random.normal(k5, (N2, D2), dtype=jnp.float32)
    nk2 = jax.random.normal(k6, (M2, D2), dtype=jnp.float32)

    ref2_self = _ref_loss(q2, p2, temperature=0.07)
    ref2_unp = _ref_loss(q2, p2, nk2, temperature=0.07)
    ref2_unp_sum = _ref_loss(q2, p2, nk2, temperature=0.07, reduction="sum")

    l2_self = ntxent_loss(q2, p2, temperature=0.07, block_q=64,
                          use_bf16_matmul=False)                      # resident keys (auto)
    l2_unp = ntxent_loss(q2, p2, nk2, temperature=0.07, reduction="sum",
                         block_q=32, block_k=128, use_bf16_matmul=False,
                         keys_resident=False)                          # streamed keys
    jax.block_until_ready(l2_self)
    jax.block_until_ready(l2_unp)
    assert jnp.allclose(l2_self, ref2_self, rtol=1e-4, atol=1e-4)
    assert jnp.allclose(l2_unp, ref2_unp_sum, rtol=1e-4, atol=1e-3)

    # Default (bf16, auto tiles / auto residency) at the multi-tile shapes.
    l2_self_bf16 = ntxent_loss(q2, p2, temperature=0.07)
    l2_unp_bf16 = ntxent_loss(q2, p2, nk2, temperature=0.07, keys_resident=False)
    jax.block_until_ready(l2_self_bf16)
    jax.block_until_ready(l2_unp_bf16)
    assert jnp.allclose(l2_self_bf16, ref2_self, rtol=1e-1, atol=3e-1)
    assert jnp.allclose(l2_unp_bf16, ref2_unp, rtol=1e-1, atol=3e-1)

    print("KERNEL_OK")
</pallas_src>

<mosaic_0001>
module attributes {stable_mosaic.version = 11 : i64} {
  func.func @_normalize_qp_kernel(%arg0: i32, %arg1: memref<16x128xf32, #tpu.memory_space<vmem>>, %arg2: memref<16x128xf32, #tpu.memory_space<vmem>>, %arg3: memref<16x128xf32, #tpu.memory_space<vmem>>, %arg4: memref<16x128xf32, #tpu.memory_space<vmem>>, %arg5: memref<16x1xf32, #tpu.memory_space<vmem>>) attributes {dimension_semantics = [#tpu.dimension_semantics<parallel>], iteration_bounds = array<i64: 1>, scalar_prefetch = 0 : i64, scratch_operands = 0 : i64, tpu.core_type = #tpu.core_type<tc>, window_params = [{transform_indices = @transform_0, window_bounds = array<i64: 16, 128>}, {transform_indices = @transform_1, window_bounds = array<i64: 16, 128>}, {transform_indices = @transform_2, window_bounds = array<i64: 16, 128>}, {transform_indices = @transform_3, window_bounds = array<i64: 16, 128>}, {transform_indices = @transform_4, window_bounds = array<i64: 16, 1>}]} {
    %c0 = arith.constant 0 : index
    %c0_0 = arith.constant 0 : index
    %0 = vector.load %arg1[%c0, %c0_0] : memref<16x128xf32, #tpu.memory_space<vmem>>, vector<16x128xf32>
    %c0_1 = arith.constant 0 : index
    %c0_2 = arith.constant 0 : index
    %1 = vector.load %arg2[%c0_1, %c0_2] : memref<16x128xf32, #tpu.memory_space<vmem>>, vector<16x128xf32>
    %2 = arith.mulf %0, %0 : vector<16x128xf32>
    %cst = arith.constant dense<0.000000e+00> : vector<16xf32>
    %3 = vector.multi_reduction <add>, %2, %cst [1] : vector<16x128xf32> to vector<16xf32>
    %4 = vector.shape_cast %3 : vector<16xf32> to vector<16x1xf32>
    %cst_3 = arith.constant 1.000000e-24 : f32
    %5 = vector.broadcast %cst_3 : f32 to vector<16x1xf32>
    %6 = arith.maximumf %4, %5 : vector<16x1xf32>
    %7 = math.rsqrt %6 : vector<16x1xf32>
    %8 = arith.mulf %1, %1 : vector<16x128xf32>
    %cst_4 = arith.constant dense<0.000000e+00> : vector<16xf32>
    %9 = vector.multi_reduction <add>, %8, %cst_4 [1] : vector<16x128xf32> to vector<16xf32>
    %10 = vector.shape_cast %9 : vector<16xf32> to vector<16x1xf32>
    %cst_5 = arith.constant 1.000000e-24 : f32
    %11 = vector.broadcast %cst_5 : f32 to vector<16x1xf32>
    %12 = arith.maximumf %10, %11 : vector<16x1xf32>
    %13 = math.rsqrt %12 : vector<16x1xf32>
    %14 = vector.broadcast %7 : vector<16x1xf32> to vector<16x128xf32>
    %15 = arith.mulf %0, %14 : vector<16x128xf32>
    %16 = vector.broadcast %13 : vector<16x1xf32> to vector<16x128xf32>
    %17 = arith.mulf %1, %16 : vector<16x128xf32>
    %c0_6 = arith.constant 0 : index
    %c0_7 = arith.constant 0 : index
    %18 = vector.load %arg3[%c0_6, %c0_7] : memref<16x128xf32, #tpu.memory_space<vmem>>, vector<16x128xf32>
    tpu.vector_store %arg3[%c0_6, %c0_7], %15 {strides = array<i32>} : memref<16x128xf32, #tpu.memory_space<vmem>>, vector<16x128xf32>,
    %c0_8 = arith.constant 0 : index
    %c0_9 = arith.constant 0 : index
    %19 = vector.load %arg4[%c0_8, %c0_9] : memref<16x128xf32, #tpu.memory_space<vmem>>, vector<16x128xf32>
    tpu.vector_store %arg4[%c0_8, %c0_9], %17 {strides = array<i32>} : memref<16x128xf32, #tpu.memory_space<vmem>>, vector<16x128xf32>,
    %20 = arith.mulf %15, %17 : vector<16x128xf32>
    %cst_10 = arith.constant dense<0.000000e+00> : vector<16xf32>
    %21 = vector.multi_reduction <add>, %20, %cst_10 [1] : vector<16x128xf32> to vector<16xf32>
    %22 = vector.shape_cast %21 : vector<16xf32> to vector<16x1xf32>
    %cst_11 = arith.constant 1.000000e+01 : f32
    %23 = vector.broadcast %cst_11 : f32 to vector<16x1xf32>
    %24 = arith.mulf %22, %23 : vector<16x1xf32>
    %c0_12 = arith.constant 0 : index
    %c0_13 = arith.constant 0 : index
    %25 = vector.load %arg5[%c0_12, %c0_13] : memref<16x1xf32, #tpu.memory_space<vmem>>, vector<16x1xf32>
    tpu.vector_store %arg5[%c0_12, %c0_13], %24 {strides = array<i32>} : memref<16x1xf32, #tpu.memory_space<vmem>>, vector<16x1xf32>,
    return
  }
  func.func @transform_0(%arg0: i32) -> (i32, i32) {
    %c0_i32 = arith.constant 0 : i32
    %c0_i32_0 = arith.constant 0 : i32
    return %arg0, %c0_i32 : i32, i32
  }
  func.func @transform_1(%arg0: i32) -> (i32, i32) {
    %c0_i32 = arith.constant 0 : i32
    %c0_i32_0 = arith.constant 0 : i32
    return %arg0, %c0_i32 : i32, i32
  }
  func.func @transform_2(%arg0: i32) -> (i32, i32) {
    %c0_i32 = arith.constant 0 : i32
    %c0_i32_0 = arith.constant 0 : i32
    return %arg0, %c0_i32 : i32, i32
  }
  func.func @transform_3(%arg0: i32) -> (i32, i32) {
    %c0_i32 = arith.constant 0 : i32
    %c0_i32_0 = arith.constant 0 : i32
    return %arg0, %c0_i32 : i32, i32
  }
  func.func @transform_4(%arg0: i32) -> (i32, i32) {
    %c0_i32 = arith.constant 0 : i32
    %c0_i32_0 = arith.constant 0 : i32
    return %arg0, %c0_i32 : i32, i32
  }
}

</mosaic_0001>

<bundles_post_ra>
// kernel: tpu_custom_call.1
= control target key start
LH: loop header
LB: loop body
LE: loop exit
PB: predicated region body
PF: predicated region fallthrough
CT: control target
= control target key end

     0   :  { %10 = vsyncpa [#allocation3], 0  ;;  %s358_s0 = inlined_call_operand.hbm [shape: f32[16,128], index: 0, kind: input, shape index: {}]   ;;  %s359_s1 = inlined_call_operand.hbm [shape: f32[16,128], index: 1, kind: input, shape index: {}]   ;;  %s360_s2 = inlined_call_operand.hbm [shape: f32[16,128], index: 2, kind: output, shape index: {0}]   ;;  %s361_s3 = inlined_call_operand.hbm [shape: f32[16,128], index: 3, kind: output, shape index: {1}]   ;;  %s362_s4 = inlined_call_operand.vmem [shape: f32[16,1], index: 4, kind: output, shape index: {2}]  }
   0x1   :  { %11 = vsyncpa [#allocation6], 0 }
   0x2   :  { %12 = vsyncpa [#allocation4], 0 }
   0x3   :  { %13 = vsyncpa [#allocation9], 0  ;;  %s18_s17 = sshll.u32 %s358_s0, 4  ;;  %s287_s18 = smov [#allocation2]   ;;  %s19_s17 = int_to_ptr.hbm [resolvable:$true] %s18_s17 }
   0x4   :  { %s20_s19 = sshll.u32 %s287_s18, 4  ;;  %s31_s22 = sshll.u32 %s359_s1, 4  ;;  %s21_s19 = int_to_ptr.vmem [resolvable:$true] %s20_s19  ;;  %s32_s22 = int_to_ptr.hbm [resolvable:$true] %s31_s22 }
   0x5   :  { %s288_s23 = smov 128   ;;  %s289_s24 = smov 8  }
   0x6   :  { %26 = dma.hbm_to_vmem [thread:$0]  %s19_s17, 256, %s21_s19, [#allocation3], %s288_s23, %s288_s23, %s289_s24  }
   0x7   :  { %s290_s25 = smov [#allocation5]  }
   0x8   :  { %s33_s26 = sshll.u32 %s290_s25, 4  ;;  %s34_s26 = int_to_ptr.vmem [resolvable:$true] %s33_s26 }
   0x9   :  { %39 = dma.hbm_to_vmem [thread:$0]  %s32_s22, 256, %s34_s26, [#allocation6], %s288_s23, %s288_s23, %s289_s24  }
   0xa   :  { %279 = dma.done.wait [#allocation3], 256  }
   0xb   :  { %280 = vsyncadd [#allocation3], 4294967040 }
   0xc   :  { %281 = dma.done.wait [#allocation6], 256  }
   0xd   :  { %282 = vsyncadd [#allocation6], 4294967040  ;;  %v50_v0 = vld [vmem:[#allocation5] sm:$0xff]  ;;  %v48_v1 = vld [vmem:[#allocation2] sm:$0xff]  ;;  %s291_s0 = smov [#allocation8]   ;;  %s146_s29 = sshll.u32 %s361_s3, 4  ;;  %s147_s29 = int_to_ptr.hbm [resolvable:$true] %s146_s29 }
   0xe   :  { %v80_v2 = vmul.f32 %v50_v0, %v50_v0  ;;  %v52_v3 = vmul.f32 %v48_v1, %v48_v1  ;;  %v330_v4 = vld [vmem:[#allocation5 + $0x8] sm:$0xff]  ;;  %v332_v5 = vld [vmem:[#allocation2 + $0x8] sm:$0xff]  ;;  %s144_s1 = sshll.u32 %s291_s0, 4  ;;  %s292_s30 = smov [#allocation7]   ;;  %vm124_vm12 = vcmask 7168   ;;  %s145_s1 = int_to_ptr.vmem [resolvable:$true] %s144_s1 }
   0xf   :  { %v81_v6 = vmul.f32 %v330_v4, %v330_v4  ;;  %v53_v7 = vmul.f32 %v332_v5, %v332_v5  ;;  %s131_s5 = sshll.u32 %s292_s30, 4  ;;  %s133_s8 = sshll.u32 %s360_s2, 4  ;;  %s132_s5 = int_to_ptr.vmem [resolvable:$true] %s131_s5  ;;  %s134_s8 = int_to_ptr.hbm [resolvable:$true] %s133_s8 }
  0x10   :  { %82 = vadd.xlane.f32.xlu1 %v80_v2  ;;  %54 = vadd.xlane.f32.xlu0 %v52_v3 }
  0x18   :  { %84 = vadd.xlane.f32.xlu1 %v81_v6  ;;  %56 = vadd.xlane.f32.xlu0 %v53_v7 }
  0x83   :  { %v83_v8 = vpop.xlane.xlu1 %82  ;;  %v55_v9 = vpop.xlane.xlu0 %54 }
  0x84   :  { %v86_v10 = vmax.f32 %v83_v8, 1e-24  ;;  %v58_v11 = vmax.f32 %v55_v9, 1e-24 }
  0x86   :  { %175 = vrsqrt.f32 %v86_v10  ;;  %vm94_vm2 = vweird.f32 %v86_v10  ;;  %vm66_vm3 = vweird.f32 %v58_v11 }
  0x87   :  { %177 = vrsqrt.f32 %v58_v11 }
  0x8b   :  { %v85_v12 = vpop.xlane.xlu1 %84  ;;  %v57_v13 = vpop.xlane.xlu0 %56 }
  0x8c   :  { %v176_v14 = vpop.eup %175  ;;  %v87_v15 = vmax.f32 %v85_v12, 1e-24  ;;  %v59_v16 = vmax.f32 %v57_v13, 1e-24 }
  0x8d   :  { %v178_v17 = vpop.eup %177  ;;  %v89_v18 = vmul.f32 %v176_v14, %v86_v10  ;;  %vm95_vm0 = vweird.f32 %v176_v14 }
  0x8e   :  { %v61_v19 = vmul.f32 %v178_v17, %v58_v11  ;;  %179 = vrsqrt.f32 %v87_v15  ;;  %vm67_vm1 = vweird.f32 %v178_v17  ;;  %vm96_vm4 = vmor %vm94_vm2, %vm95_vm0  ;;  %vm104_vm8 = vweird.f32 %v87_v15 }
  0x8f   :  { %v90_v20 = vmul.f32 %v176_v14, %v89_v18  ;;  %181 = vrsqrt.f32 %v59_v16  ;;  %vm68_vm5 = vmor %vm66_vm3, %vm67_vm1  ;;  %vm76_vm10 = vweird.f32 %v59_v16 }
  0x90   :  { %v62_v21 = vmul.f32 %v178_v17, %v61_v19 }
  0x91   :  { %v91_v22 = vmul.f32 0.5, %v90_v20 }
  0x92   :  { %v63_v23 = vmul.f32 0.5, %v62_v21 }
  0x93   :  { %v92_v24 = vsub.f32 1.5, %v91_v22 }
  0x94   :  { %v180_v25 = vpop.eup %179  ;;  %v64_v26 = vsub.f32 1.5, %v63_v23 }
  0x95   :  { %v182_v27 = vpop.eup %181  ;;  %v99_v28 = vmul.f32 %v180_v25, %v87_v15  ;;  %v93_v29 = vmul.f32 %v176_v14, %v92_v24  ;;  %vm105_vm6 = vweird.f32 %v180_v25 }
  0x96   :  { %v71_v30 = vmul.f32 %v182_v27, %v59_v16  ;;  %v65_v31 = vmul.f32 %v178_v17, %v64_v26  ;;  %vm77_vm7 = vweird.f32 %v182_v27  ;;  %vm106_vm9 = vmor %vm104_vm8, %vm105_vm6 }
  0x97   :  { %v100_v32 = vmul.f32 %v180_v25, %v99_v28  ;;  %v97_v33 = vsel %vm96_vm4, %v176_v14, %v93_v29  ;;  %vm78_vm11 = vmor %vm76_vm10, %vm77_vm7 }
  0x98   :  { %v72_v34 = vmul.f32 %v182_v27, %v71_v30  ;;  %v69_v35 = vsel %vm68_vm5, %v178_v17, %v65_v31  ;;  %v110_v36 = vmul.f32 %v97_v33, %v50_v0 }
  0x99   :  { %v101_v37 = vmul.f32 0.5, %v100_v32  ;;  %v108_v38 = vmul.f32 %v69_v35, %v48_v1 }
  0x9a   :  { %v73_v39 = vmul.f32 0.5, %v72_v34  ;;  %114 = vst [vmem:[#allocation8] sm:$0xff] %v110_v36 }
  0x9b   :  { %v102_v40 = vsub.f32 1.5, %v101_v37  ;;  %v116_v41 = vmul.f32 %v110_v36, %v108_v38  ;;  %112 = vst [vmem:[#allocation7] sm:$0xff] %v108_v38 }
  0x9c   :  { %v74_v42 = vsub.f32 1.5, %v73_v39 }
  0x9d   :  { %118 = vadd.xlane.f32.xlu2 %v116_v41  ;;  %v103_v43 = vmul.f32 %v180_v25, %v102_v40 }
  0x9e   :  { %v75_v44 = vmul.f32 %v182_v27, %v74_v42 }
  0x9f   :  { %v107_v45 = vsel %vm106_vm9, %v180_v25, %v103_v43 }
  0xa0   :  { %v79_v46 = vsel %vm78_vm11, %v182_v27, %v75_v44  ;;  %v111_v47 = vmul.f32 %v107_v45, %v330_v4 }
  0xa1   :  { %v109_v48 = vmul.f32 %v79_v46, %v332_v5 }
  0xa2   :  { %115 = vst [vmem:[#allocation8 + $0x8] sm:$0xff] %v111_v47 }
  0xa3   :  { %v117_v49 = vmul.f32 %v111_v47, %v109_v48  ;;  %113 = vst [vmem:[#allocation7 + $0x8] sm:$0xff] %v109_v48  ;;  %152 = dma.vmem_to_hbm [thread:$0]  %s145_s1, 256, %s147_s29, [#allocation9], %s288_s23, %s288_s23, %s289_s24  }
  0xa4   :  { %139 = dma.vmem_to_hbm [thread:$0]  %s132_s5, 256, %s134_s8, [#allocation4], %s288_s23, %s288_s23, %s289_s24  }
  0xa5   :  { %120 = vadd.xlane.f32.xlu2 %v117_v49 }
 0x110   :  { %v119_v50 = vpop.xlane.xlu2 %118 }
 0x111   :  { %v122_v51 = vmul.f32 10.0, %v119_v50 }
 0x113   :  { %125 = vst.msk [vmem:[%s362_s4] sm:$0xff] %vm124_vm12, %v122_v51 }
 0x118   :  { %v121_v52 = vpop.xlane.xlu2 %120 }
 0x119   :  { %v123_v53 = vmul.f32 10.0, %v121_v52 }
 0x11b   :  { %126 = vst.msk [vmem:[%s362_s4 + $0x8] sm:$0xff] %vm124_vm12, %v123_v53 }
 0x11c   :  { %283 = dma.done.wait [#allocation4], 256  }
 0x11d   :  { %284 = vsyncadd [#allocation4], 4294967040 }
 0x11e   :  { %285 = dma.done.wait [#allocation9], 256  }
 0x11f   :  { %286 = vsyncadd [#allocation9], 4294967040 }
 0x120   :  { %165 = vsyncpa [#allocation3], 1 }
 0x121   :  { %166 = vsyncpa [#allocation6], 1 }
 0x122   :  { %167 = vsyncpa [#allocation4], 1 }
 0x123   :  { %168 = vsyncpa [#allocation9], 1 }

</bundles_post_ra>
